<compile_context>
chip_gen: v6e
topology: v6e:2x2x1
jax: 0.10.0
libtpu: 0.0.40
codegen_flags: <defaults>
</compile_context>

<pallas_src>
import functools

import jax
import jax.numpy as jnp
from jax.experimental import pallas as pl
from jax.experimental.pallas import tpu as pltpu

BN_EPS = 1e-5
LANE = 128
SUBLANE = 8


def _round_up(n, m):
    return ((n + m - 1) // m) * m


def _pad2(a, shape):
    pads = [(0, t - s) for s, t in zip(a.shape, shape)]
    if any(p[1] for p in pads):
        a = jnp.pad(a, pads)
    return a


def _vmem_budgets():
    """(tile_budget_bytes, vmem_limit_bytes), per TPU generation when queryable.
    v5e/v6e have 128 MiB VMEM/core, v7x has 64 MiB. Use ~60% of capacity as the
    working tile budget and ~80% as the scoped-VMEM limit."""
    try:
        cap = int(getattr(pltpu.get_tpu_info(), "vmem_capacity_bytes", 0))
    except Exception:
        cap = 0
    if cap <= 0:
        cap = 64 << 20  # conservative fallback: assume the smallest (v7x) VMEM
    vmem_limit = min(int(cap * 0.8), 112 << 20)
    tile_budget = min(int(cap * 0.6), vmem_limit - (6 << 20))
    return tile_budget, vmem_limit


def _single_buffer_supported():
    """Probe whether this JAX accepts pipeline_mode=pl.Buffered on BlockSpec
    (used to single-buffer grid-invariant parameter blocks)."""
    try:
        pl.BlockSpec((SUBLANE, LANE), lambda p, j: (0, 0),
                     pipeline_mode=pl.Buffered(buffer_count=1))
        return True
    except Exception:
        return False


def _vmem_usage(tb, cache_h, batch, d_in_p, d_hid_p, d_out_p,
                mm_bytes, out_bytes, param_factor):
    """Estimated VMEM footprint for a given batch tile / caching choice."""
    params = param_factor * ((d_in_p * d_hid_p + d_hid_p * d_out_p) * mm_bytes
                             + (2 * d_hid_p + d_out_p) * 4)
    stats = 2 * d_hid_p * 4
    per_row = (2 * d_in_p * mm_bytes      # x tile, double-buffered
               + 2 * d_out_p * out_bytes  # out tile, double-buffered
               + 4 * d_hid_p * 4          # f32 h / h*h / BN-ReLU intermediates
               + 2 * d_out_p * 4)         # f32 second-matmul accumulator
    cache = _round_up(batch, tb) * d_hid_p * 4 if cache_h else 0
    return params + stats + cache + tb * per_row


def _plan_tiles(batch, d_in_p, d_hid_p, d_out_p, mm_bytes, out_bytes,
                budget, row_align, param_factor):
    """Largest batch tile (multiple of row_align) fitting the VMEM budget,
    preferring the full-batch hidden-activation cache (no phase-1 recompute)."""
    batch_cap = _round_up(batch, row_align)
    for cache_h in (True, False):
        tb = min(1024, batch_cap)
        while tb > row_align and _vmem_usage(
                tb, cache_h, batch, d_in_p, d_hid_p, d_out_p,
                mm_bytes, out_bytes, param_factor) > budget:
            tb = _round_up(tb // 2, row_align)
        if _vmem_usage(tb, cache_h, batch, d_in_p, d_hid_p, d_out_p,
                       mm_bytes, out_bytes, param_factor) <= budget:
            return tb, cache_h
    return row_align, False  # smallest tile, recompute path
    # TODO(synk): add K-tiling over d_in/d_hid if W1/W2 alone exceed the budget.


def _projection_head_kernel(x_ref, w1_ref, gamma_ref, beta_ref, w2_ref, b2_ref,
                            o_ref, *scratch, batch_size, tb, cache_h):
    if cache_h:
        h_cache, sum_ref, sumsq_ref = scratch
    else:
        h_cache = None
        sum_ref, sumsq_ref = scratch

    phase = pl.program_id(0)   # 0: first matmul + BN stats, 1: BN/ReLU + 2nd matmul
    tile = pl.program_id(1)    # batch-tile index
    row0 = pl.multiple_of(tile * tb, tb)

    @pl.when(jnp.logical_and(phase == 0, tile == 0))
    def _init_stats():
        sum_ref[...] = jnp.zeros_like(sum_ref)
        sumsq_ref[...] = jnp.zeros_like(sumsq_ref)

    @pl.when(phase == 0)
    def _first_matmul_and_stats():
        # Block-1 linear (no bias); MXU with f32 accumulation.
        h = jnp.dot(x_ref[...], w1_ref[...], preferred_element_type=jnp.float32)
        if cache_h:
            h_cache[pl.ds(row0, tb), :] = h   # reused in phase 1 (no recompute)
        # Batch reductions on the VPU/XLU slots (idle while the MXU runs x@W1);
        # zero-padded batch rows contribute exactly 0.
        sum_ref[...] += jnp.sum(h, axis=0, keepdims=True)
        sumsq_ref[...] += jnp.sum(h * h, axis=0, keepdims=True)

    @pl.when(jnp.logical_and(phase == 1, tile == 0))
    def _finalize_stats():
        # Training-mode BatchNorm1d: global batch mean, biased variance, in f32.
        # Fold gamma/beta into a single scale/shift, stored back into the stats
        # scratch so every phase-1 tile is just a fused multiply-add.
        inv_b = jnp.float32(1.0 / batch_size)
        mean = sum_ref[...] * inv_b
        # TODO(synk): E[h^2]-E[h]^2 (clamped) can cancel for large-mean features;
        # switch to mean-shifted accumulation if inputs are far from zero-mean.
        var = jnp.maximum(sumsq_ref[...] * inv_b - mean * mean, 0.0)
        scale = jax.lax.rsqrt(var + BN_EPS) * gamma_ref[...]
        sum_ref[...] = scale
        sumsq_ref[...] = beta_ref[...] - mean * scale

    @pl.when(phase == 1)
    def _apply():
        if cache_h:
            h = h_cache[pl.ds(row0, tb), :]
        else:
            h = jnp.dot(x_ref[...], w1_ref[...],
                        preferred_element_type=jnp.float32)
        scale = sum_ref[...]
        shift = sumsq_ref[...]
        hn = jnp.maximum(h * scale + shift, 0.0)            # BN + ReLU (f32)
        out = jnp.dot(hn.astype(w2_ref.dtype), w2_ref[...],
                      preferred_element_type=jnp.float32) + b2_ref[...]
        o_ref[...] = out.astype(o_ref.dtype)


def projection_head_forward(x, w1, gamma, beta, w2, b2, *,
                            matmul_dtype=jnp.bfloat16, batch_tile=None,
                            cache_hidden=None):
    """Fused ProjectionHead forward:
        Linear(no bias) -> BatchNorm1d(train) -> ReLU -> Linear(bias).

    x: (B, D_in); w1: (D_in, D_hid); gamma/beta: (D_hid,) or (1, D_hid);
    w2: (D_hid, D_out); b2: (D_out,) or (1, D_out).
    matmul_dtype: MXU operand dtype (bf16 default — MXU-native on v5e/v6e/v7x and
      halves HBM traffic); accumulation and BN statistics stay in float32.
    cache_hidden: force (True/False) caching of h = x@W1 in VMEM across phases;
      None = automatic based on the VMEM budget.
    """
    out_dtype = x.dtype
    mm_dtype = jnp.dtype(matmul_dtype) if matmul_dtype is not None else jnp.dtype(x.dtype)
    out_itemsize = jnp.dtype(out_dtype).itemsize

    batch, d_in = x.shape
    d_hid = w1.shape[1]
    d_out = w2.shape[1]

    # Lane-pad feature dims to multiples of 128 (vreg lane width / MXU width).
    # TODO(synk): on v6e/v7x (2x256x256 MXUs), pad large d_hid/d_out to 256.
    d_in_p = _round_up(d_in, LANE)
    d_hid_p = _round_up(d_hid, LANE)
    d_out_p = _round_up(d_out, LANE)

    # bf16 packs rows in sublane pairs -> align batch tiles to 16 for sub-32-bit.
    row_align = 16 if mm_dtype.itemsize < 4 else SUBLANE

    tile_budget, vmem_limit = _vmem_budgets()
    single_buffer = _single_buffer_supported()
    param_factor = 1 if single_buffer else 2

    if batch_tile is None:
        tb, auto_cache = _plan_tiles(batch, d_in_p, d_hid_p, d_out_p,
                                     mm_dtype.itemsize, out_itemsize,
                                     tile_budget, row_align, param_factor)
    else:
        tb = min(_round_up(max(int(batch_tile), 1), row_align),
                 _round_up(batch, row_align))
        auto_cache = _vmem_usage(tb, True, batch, d_in_p, d_hid_p, d_out_p,
                                 mm_dtype.itemsize, out_itemsize,
                                 param_factor) <= tile_budget
    cache_h = auto_cache if cache_hidden is None else bool(cache_hidden)

    batch_p = _round_up(batch, tb)
    num_tiles = batch_p // tb

    # Zero padding is exact: padded batch rows contribute 0 to the BN sums (we
    # divide by the real batch size); padded hidden columns have gamma=0 so they
    # stay 0 through BN/ReLU and hit zero rows of W2; padded output rows/columns
    # are sliced off at the end.
    xp = _pad2(x, (batch_p, d_in_p)).astype(mm_dtype)
    w1p = _pad2(w1, (d_in_p, d_hid_p)).astype(mm_dtype)
    w2p = _pad2(w2, (d_hid_p, d_out_p)).astype(mm_dtype)
    gp = _pad2(jnp.reshape(gamma, (1, -1)), (1, d_hid_p)).astype(jnp.float32)
    bp = _pad2(jnp.reshape(beta, (1, -1)), (1, d_hid_p)).astype(jnp.float32)
    b2p = _pad2(jnp.reshape(b2, (1, -1)), (1, d_out_p)).astype(jnp.float32)

    invariant = lambda p, j: (0, 0)

    def param_spec(shape):
        # Grid-invariant blocks are fetched once; single-buffer them when the
        # JAX version supports pipeline_mode so they don't take 2x VMEM.
        if single_buffer:
            return pl.BlockSpec(shape, invariant,
                                pipeline_mode=pl.Buffered(buffer_count=1))
        return pl.BlockSpec(shape, invariant)

    if cache_h:
        # Phase 1 never reads x: pin its block index to 0 so x is not
        # re-streamed from HBM during the second pass.
        x_map = lambda p, j: (j * (1 - p), 0)
    else:
        x_map = lambda p, j: (j, 0)

    scratch = []
    if cache_h:
        scratch.append(pltpu.VMEM((batch_p, d_hid_p), jnp.float32))  # h = x@W1
    scratch += [pltpu.VMEM((1, d_hid_p), jnp.float32),   # sum(h)   -> BN scale
                pltpu.VMEM((1, d_hid_p), jnp.float32)]   # sum(h*h) -> BN shift

    kernel = functools.partial(_projection_head_kernel,
                               batch_size=batch, tb=tb, cache_h=cache_h)

    first_mm = 2 * batch_p * d_in_p * d_hid_p
    flops = first_mm * (1 if cache_h else 2) + 2 * batch_p * d_hid_p * d_out_p
    bytes_accessed = (xp.size * xp.dtype.itemsize * (1 if cache_h else 2)
                      + w1p.size * w1p.dtype.itemsize
                      + w2p.size * w2p.dtype.itemsize
                      + (gp.size + bp.size + b2p.size) * 4
                      + batch_p * d_out_p * out_itemsize)

    out_p = pl.pallas_call(
        kernel,
        out_shape=jax.ShapeDtypeStruct((batch_p, d_out_p), out_dtype),
        grid_spec=pltpu.PrefetchScalarGridSpec(
            num_scalar_prefetch=0,
            grid=(2, num_tiles),  # (phase, batch tile)
            in_specs=[
                pl.BlockSpec((tb, d_in_p), x_map),
                param_spec((d_in_p, d_hid_p)),
                param_spec((1, d_hid_p)),
                param_spec((1, d_hid_p)),
                param_spec((d_hid_p, d_out_p)),
                param_spec((1, d_out_p)),
            ],
            # Phase 0 never writes the output; mapping its iterations to block 0
            # keeps each output block a single contiguous visit, and phase-1
            # tile 0 fully writes block (0,0) before any flush to HBM.
            out_specs=pl.BlockSpec((tb, d_out_p), lambda p, j: (j * p, 0)),
            scratch_shapes=scratch,
        ),
        compiler_params=pltpu.CompilerParams(
            # Both axes must be 'arbitrary': phase 1 depends on BN statistics
            # accumulated across ALL batch tiles in a shared VMEM scratch.
            # TODO(synk): shard the batch axis across v7x's 2 TensorCores with
            # per-core partial stats + a core_barrier reduction.
            dimension_semantics=("arbitrary", "arbitrary"),
            vmem_limit_bytes=vmem_limit,
        ),
        cost_estimate=pl.CostEstimate(
            flops=flops, transcendentals=d_hid_p, bytes_accessed=bytes_accessed),
    )(xp, w1p, gp, bp, w2p, b2p)

    return out_p[:batch, :d_out]


def _reference_forward(x, w1, gamma, beta, w2, b2):
    h = x @ w1
    mean = jnp.mean(h, axis=0, keepdims=True)
    var = jnp.mean((h - mean) ** 2, axis=0, keepdims=True)   # biased, training-mode BN
    h = (h - mean) / jnp.sqrt(var + BN_EPS)
    h = h * jnp.reshape(gamma, (1, -1)) + jnp.reshape(beta, (1, -1))
    h = jnp.maximum(h, 0.0)
    return h @ w2 + jnp.reshape(b2, (1, -1))


if __name__ == "__main__":
    B, D_IN, D_HID, D_OUT = 40, 32, 32, 16

    key = jax.random.PRNGKey(0)
    kx, kw1, kw2, kb2 = jax.random.split(key, 4)

    x = jax.random.normal(kx, (B, D_IN), dtype=jnp.float32)

    # Deterministic synthetic parameters (PyTorch-like uniform init ranges).
    bound1 = 1.0 / jnp.sqrt(D_IN)
    w1 = jax.random.uniform(kw1, (D_IN, D_HID), jnp.float32, -bound1, bound1)
    gamma = jnp.ones((D_HID,), dtype=jnp.float32)   # BatchNorm1d weight init
    beta = jnp.zeros((D_HID,), dtype=jnp.float32)   # BatchNorm1d bias init

    bound2 = 1.0 / jnp.sqrt(D_HID)
    w2 = jax.random.uniform(kw2, (D_HID, D_OUT), jnp.float32, -bound2, bound2)
    b2 = jax.random.uniform(kb2, (D_OUT,), jnp.float32, -bound2, bound2)

    ref = _reference_forward(x, w1, gamma, beta, w2, b2)

    # f32 path, multiple batch tiles, h cached in VMEM across phases.
    out_f32 = jax.block_until_ready(projection_head_forward(
        x, w1, gamma, beta, w2, b2, matmul_dtype=jnp.float32,
        batch_tile=16, cache_hidden=True))
    assert out_f32.shape == (B, D_OUT)
    assert jnp.allclose(out_f32, ref, atol=1e-4, rtol=1e-4), "f32 cached-h mismatch"

    # f32 path, recompute fallback (no h cache) — exercises the other branch.
    out_nc = jax.block_until_ready(projection_head_forward(
        x, w1, gamma, beta, w2, b2, matmul_dtype=jnp.float32,
        batch_tile=16, cache_hidden=False))
    assert jnp.allclose(out_nc, ref, atol=1e-4, rtol=1e-4), "f32 recompute mismatch"

    # Default fast path: bf16 MXU operands, auto tile/cache planning.
    out_bf16 = jax.block_until_ready(
        projection_head_forward(x, w1, gamma, beta, w2, b2))
    assert out_bf16.shape == (B, D_OUT)
    assert jnp.allclose(out_bf16, ref, atol=5e-2, rtol=5e-2), "bf16 kernel mismatch"

    print("KERNEL_OK")
</pallas_src>

<mosaic_0001>
module attributes {stable_mosaic.version = 11 : i64} {
  func.func @_projection_head_kernel(%arg0: i32, %arg1: i32, %arg2: memref<16x128xf32, #tpu.memory_space<vmem>>, %arg3: memref<128x128xf32, #tpu.memory_space<vmem>>, %arg4: memref<1x128xf32, #tpu.memory_space<vmem>>, %arg5: memref<1x128xf32, #tpu.memory_space<vmem>>, %arg6: memref<128x128xf32, #tpu.memory_space<vmem>>, %arg7: memref<1x128xf32, #tpu.memory_space<vmem>>, %arg8: memref<16x128xf32, #tpu.memory_space<vmem>>, %arg9: memref<48x128xf32, #tpu.memory_space<vmem>>, %arg10: memref<1x128xf32, #tpu.memory_space<vmem>>, %arg11: memref<1x128xf32, #tpu.memory_space<vmem>>) attributes {dimension_semantics = [#tpu.dimension_semantics<arbitrary>, #tpu.dimension_semantics<arbitrary>], iteration_bounds = array<i64: 2, 3>, scalar_prefetch = 0 : i64, scratch_operands = 3 : i64, tpu.core_type = #tpu.core_type<tc>, window_params = [{transform_indices = @transform_0, window_bounds = array<i64: 16, 128>}, {pipeline_mode = #tpu.pipeline_mode<synchronous>, transform_indices = @transform_1, window_bounds = array<i64: 128, 128>}, {pipeline_mode = #tpu.pipeline_mode<synchronous>, transform_indices = @transform_2, window_bounds = array<i64: 1, 128>}, {pipeline_mode = #tpu.pipeline_mode<synchronous>, transform_indices = @transform_3, window_bounds = array<i64: 1, 128>}, {pipeline_mode = #tpu.pipeline_mode<synchronous>, transform_indices = @transform_4, window_bounds = array<i64: 128, 128>}, {pipeline_mode = #tpu.pipeline_mode<synchronous>, transform_indices = @transform_5, window_bounds = array<i64: 1, 128>}, {transform_indices = @transform_6, window_bounds = array<i64: 16, 128>}]} {
    %c16_i32 = arith.constant 16 : i32
    %0 = arith.muli %arg1, %c16_i32 : i32
    %1 = tpu.assume_multiple %0, 16 : i32
    %c0_i32 = arith.constant 0 : i32
    %2 = arith.cmpi eq, %arg0, %c0_i32 : i32
    %c0_i32_0 = arith.constant 0 : i32
    %3 = arith.cmpi eq, %arg1, %c0_i32_0 : i32
    %4 = arith.andi %2, %3 : i1
    %5 = arith.extui %4 : i1 to i32
    %c0_i32_1 = arith.constant 0 : i32
    %6 = arith.cmpi ne, %5, %c0_i32_1 : i32
    scf.if %6 {
      %cst = arith.constant 0.000000e+00 : f32
      %18 = vector.broadcast %cst : f32 to vector<1x128xf32>
      %c0 = arith.constant 0 : index
      %c0_8 = arith.constant 0 : index
      %19 = vector.load %arg10[%c0, %c0_8] : memref<1x128xf32, #tpu.memory_space<vmem>>, vector<1x128xf32>
      tpu.vector_store %arg10[%c0, %c0_8], %18 {strides = array<i32>} : memref<1x128xf32, #tpu.memory_space<vmem>>, vector<1x128xf32>,
      %cst_9 = arith.constant 0.000000e+00 : f32
      %20 = vector.broadcast %cst_9 : f32 to vector<1x128xf32>
      %c0_10 = arith.constant 0 : index
      %c0_11 = arith.constant 0 : index
      %21 = vector.load %arg11[%c0_10, %c0_11] : memref<1x128xf32, #tpu.memory_space<vmem>>, vector<1x128xf32>
      tpu.vector_store %arg11[%c0_10, %c0_11], %20 {strides = array<i32>} : memref<1x128xf32, #tpu.memory_space<vmem>>, vector<1x128xf32>,
    } else {
    }
    %c0_i32_2 = arith.constant 0 : i32
    %7 = arith.cmpi eq, %arg0, %c0_i32_2 : i32
    %8 = arith.extui %7 : i1 to i32
    %c0_i32_3 = arith.constant 0 : i32
    %9 = arith.cmpi ne, %8, %c0_i32_3 : i32
    scf.if %9 {
      %c0 = arith.constant 0 : index
      %c0_8 = arith.constant 0 : index
      %18 = vector.load %arg2[%c0, %c0_8] : memref<16x128xf32, #tpu.memory_space<vmem>>, vector<16x128xf32>
      %c0_9 = arith.constant 0 : index
      %c0_10 = arith.constant 0 : index
      %19 = vector.load %arg3[%c0_9, %c0_10] : memref<128x128xf32, #tpu.memory_space<vmem>>, vector<128x128xf32>
      %cst = arith.constant dense<0.000000e+00> : vector<16x128xf32>
      %20 = tpu.matmul %18, %19, %cst {dimension_numbers = #tpu.dot_dimension_numbers<[1], [0], [0], [1], [0, 0, 1, 1], [], []>} : vector<16x128xf32>, vector<128x128xf32>, vector<16x128xf32> -> vector<16x128xf32>
      %21 = arith.index_cast %1 : i32 to index
      %c0_11 = arith.constant 0 : index
      %22 = vector.load %arg9[%21, %c0_11] : memref<48x128xf32, #tpu.memory_space<vmem>>, vector<16x128xf32>
      tpu.vector_store %arg9[%21, %c0_11], %20 {strides = array<i32>} : memref<48x128xf32, #tpu.memory_space<vmem>>, vector<16x128xf32>,
      %c0_12 = arith.constant 0 : index
      %c0_13 = arith.constant 0 : index
      %23 = vector.load %arg10[%c0_12, %c0_13] : memref<1x128xf32, #tpu.memory_space<vmem>>, vector<1x128xf32>
      %cst_14 = arith.constant dense<0.000000e+00> : vector<128xf32>
      %24 = vector.multi_reduction <add>, %20, %cst_14 [0] : vector<16x128xf32> to vector<128xf32>
      %25 = vector.shape_cast %24 : vector<128xf32> to vector<1x128xf32>
      %26 = arith.addf %23, %25 : vector<1x128xf32>
      %c0_15 = arith.constant 0 : index
      %c0_16 = arith.constant 0 : index
      %27 = vector.load %arg10[%c0_15, %c0_16] : memref<1x128xf32, #tpu.memory_space<vmem>>, vector<1x128xf32>
      tpu.vector_store %arg10[%c0_15, %c0_16], %26 {strides = array<i32>} : memref<1x128xf32, #tpu.memory_space<vmem>>, vector<1x128xf32>,
      %c0_17 = arith.constant 0 : index
      %c0_18 = arith.constant 0 : index
      %28 = vector.load %arg11[%c0_17, %c0_18] : memref<1x128xf32, #tpu.memory_space<vmem>>, vector<1x128xf32>
      %29 = arith.mulf %20, %20 : vector<16x128xf32>
      %cst_19 = arith.constant dense<0.000000e+00> : vector<128xf32>
      %30 = vector.multi_reduction <add>, %29, %cst_19 [0] : vector<16x128xf32> to vector<128xf32>
      %31 = vector.shape_cast %30 : vector<128xf32> to vector<1x128xf32>
      %32 = arith.addf %28, %31 : vector<1x128xf32>
      %c0_20 = arith.constant 0 : index
      %c0_21 = arith.constant 0 : index
      %33 = vector.load %arg11[%c0_20, %c0_21] : memref<1x128xf32, #tpu.memory_space<vmem>>, vector<1x128xf32>
      tpu.vector_store %arg11[%c0_20, %c0_21], %32 {strides = array<i32>} : memref<1x128xf32, #tpu.memory_space<vmem>>, vector<1x128xf32>,
    } else {
    }
    %c1_i32 = arith.constant 1 : i32
    %10 = arith.cmpi eq, %arg0, %c1_i32 : i32
    %c0_i32_4 = arith.constant 0 : i32
    %11 = arith.cmpi eq, %arg1, %c0_i32_4 : i32
    %12 = arith.andi %10, %11 : i1
    %13 = arith.extui %12 : i1 to i32
    %c0_i32_5 = arith.constant 0 : i32
    %14 = arith.cmpi ne, %13, %c0_i32_5 : i32
    scf.if %14 {
      %c0 = arith.constant 0 : index
      %c0_8 = arith.constant 0 : index
      %18 = vector.load %arg10[%c0, %c0_8] : memref<1x128xf32, #tpu.memory_space<vmem>>, vector<1x128xf32>
      %cst = arith.constant 2.500000e-02 : f32
      %19 = vector.broadcast %cst : f32 to vector<1x128xf32>
      %20 = arith.mulf %18, %19 : vector<1x128xf32>
      %c0_9 = arith.constant 0 : index
      %c0_10 = arith.constant 0 : index
      %21 = vector.load %arg11[%c0_9, %c0_10] : memref<1x128xf32, #tpu.memory_space<vmem>>, vector<1x128xf32>
      %cst_11 = arith.constant 2.500000e-02 : f32
      %22 = vector.broadcast %cst_11 : f32 to vector<1x128xf32>
      %23 = arith.mulf %21, %22 : vector<1x128xf32>
      %24 = arith.mulf %20, %20 : vector<1x128xf32>
      %25 = arith.subf %23, %24 : vector<1x128xf32>
      %cst_12 = arith.constant 0.000000e+00 : f32
      %26 = vector.broadcast %cst_12 : f32 to vector<1x128xf32>
      %27 = arith.maximumf %25, %26 : vector<1x128xf32>
      %cst_13 = arith.constant 9.99999974E-6 : f32
      %28 = vector.broadcast %cst_13 : f32 to vector<1x128xf32>
      %29 = arith.addf %27, %28 : vector<1x128xf32>
      %30 = math.rsqrt %29 : vector<1x128xf32>
      %c0_14 = arith.constant 0 : index
      %c0_15 = arith.constant 0 : index
      %31 = vector.load %arg4[%c0_14, %c0_15] : memref<1x128xf32, #tpu.memory_space<vmem>>, vector<1x128xf32>
      %32 = arith.mulf %30, %31 : vector<1x128xf32>
      %c0_16 = arith.constant 0 : index
      %c0_17 = arith.constant 0 : index
      %33 = vector.load %arg10[%c0_16, %c0_17] : memref<1x128xf32, #tpu.memory_space<vmem>>, vector<1x128xf32>
      tpu.vector_store %arg10[%c0_16, %c0_17], %32 {strides = array<i32>} : memref<1x128xf32, #tpu.memory_space<vmem>>, vector<1x128xf32>,
      %c0_18 = arith.constant 0 : index
      %c0_19 = arith.constant 0 : index
      %34 = vector.load %arg5[%c0_18, %c0_19] : memref<1x128xf32, #tpu.memory_space<vmem>>, vector<1x128xf32>
      %35 = arith.mulf %20, %32 : vector<1x128xf32>
      %36 = arith.subf %34, %35 : vector<1x128xf32>
      %c0_20 = arith.constant 0 : index
      %c0_21 = arith.constant 0 : index
      %37 = vector.load %arg11[%c0_20, %c0_21] : memref<1x128xf32, #tpu.memory_space<vmem>>, vector<1x128xf32>
      tpu.vector_store %arg11[%c0_20, %c0_21], %36 {strides = array<i32>} : memref<1x128xf32, #tpu.memory_space<vmem>>, vector<1x128xf32>,
    } else {
    }
    %c1_i32_6 = arith.constant 1 : i32
    %15 = arith.cmpi eq, %arg0, %c1_i32_6 : i32
    %16 = arith.extui %15 : i1 to i32
    %c0_i32_7 = arith.constant 0 : i32
    %17 = arith.cmpi ne, %16, %c0_i32_7 : i32
    scf.if %17 {
      %18 = arith.index_cast %1 : i32 to index
      %c0 = arith.constant 0 : index
      %19 = vector.load %arg9[%18, %c0] : memref<48x128xf32, #tpu.memory_space<vmem>>, vector<16x128xf32>
      %c0_8 = arith.constant 0 : index
      %c0_9 = arith.constant 0 : index
      %20 = vector.load %arg10[%c0_8, %c0_9] : memref<1x128xf32, #tpu.memory_space<vmem>>, vector<1x128xf32>
      %c0_10 = arith.constant 0 : index
      %c0_11 = arith.constant 0 : index
      %21 = vector.load %arg11[%c0_10, %c0_11] : memref<1x128xf32, #tpu.memory_space<vmem>>, vector<1x128xf32>
      %22 = vector.broadcast %20 : vector<1x128xf32> to vector<16x128xf32>
      %23 = arith.mulf %19, %22 : vector<16x128xf32>
      %24 = vector.broadcast %21 : vector<1x128xf32> to vector<16x128xf32>
      %25 = arith.addf %23, %24 : vector<16x128xf32>
      %cst = arith.constant 0.000000e+00 : f32
      %26 = vector.broadcast %cst : f32 to vector<16x128xf32>
      %27 = arith.maximumf %25, %26 : vector<16x128xf32>
      %c0_12 = arith.constant 0 : index
      %c0_13 = arith.constant 0 : index
      %28 = vector.load %arg6[%c0_12, %c0_13] : memref<128x128xf32, #tpu.memory_space<vmem>>, vector<128x128xf32>
      %cst_14 = arith.constant dense<0.000000e+00> : vector<16x128xf32>
      %29 = tpu.matmul %27, %28, %cst_14 {dimension_numbers = #tpu.dot_dimension_numbers<[1], [0], [0], [1], [0, 0, 1, 1], [], []>} : vector<16x128xf32>, vector<128x128xf32>, vector<16x128xf32> -> vector<16x128xf32>
      %c0_15 = arith.constant 0 : index
      %c0_16 = arith.constant 0 : index
      %30 = vector.load %arg7[%c0_15, %c0_16] : memref<1x128xf32, #tpu.memory_space<vmem>>, vector<1x128xf32>
      %31 = vector.broadcast %30 : vector<1x128xf32> to vector<16x128xf32>
      %32 = arith.addf %29, %31 : vector<16x128xf32>
      %c0_17 = arith.constant 0 : index
      %c0_18 = arith.constant 0 : index
      %33 = vector.load %arg8[%c0_17, %c0_18] : memref<16x128xf32, #tpu.memory_space<vmem>>, vector<16x128xf32>
      tpu.vector_store %arg8[%c0_17, %c0_18], %32 {strides = array<i32>} : memref<16x128xf32, #tpu.memory_space<vmem>>, vector<16x128xf32>,
    } else {
    }
    return
  }
  func.func @transform_0(%arg0: i32, %arg1: i32) -> (i32, i32) {
    %c1_i32 = arith.constant 1 : i32
    %0 = arith.subi %c1_i32, %arg0 : i32
    %1 = arith.muli %arg1, %0 : i32
    %c0_i32 = arith.constant 0 : i32
    %c0_i32_0 = arith.constant 0 : i32
    return %1, %c0_i32 : i32, i32
  }
  func.func @transform_1(%arg0: i32, %arg1: i32) -> (i32, i32) {
    %c0_i32 = arith.constant 0 : i32
    %c0_i32_0 = arith.constant 0 : i32
    %c0_i32_1 = arith.constant 0 : i32
    return %c0_i32, %c0_i32_0 : i32, i32
  }
  func.func @transform_2(%arg0: i32, %arg1: i32) -> (i32, i32) {
    %c0_i32 = arith.constant 0 : i32
    %c0_i32_0 = arith.constant 0 : i32
    %c0_i32_1 = arith.constant 0 : i32
    return %c0_i32, %c0_i32_0 : i32, i32
  }
  func.func @transform_3(%arg0: i32, %arg1: i32) -> (i32, i32) {
    %c0_i32 = arith.constant 0 : i32
    %c0_i32_0 = arith.constant 0 : i32
    %c0_i32_1 = arith.constant 0 : i32
    return %c0_i32, %c0_i32_0 : i32, i32
  }
  func.func @transform_4(%arg0: i32, %arg1: i32) -> (i32, i32) {
    %c0_i32 = arith.constant 0 : i32
    %c0_i32_0 = arith.constant 0 : i32
    %c0_i32_1 = arith.constant 0 : i32
    return %c0_i32, %c0_i32_0 : i32, i32
  }
  func.func @transform_5(%arg0: i32, %arg1: i32) -> (i32, i32) {
    %c0_i32 = arith.constant 0 : i32
    %c0_i32_0 = arith.constant 0 : i32
    %c0_i32_1 = arith.constant 0 : i32
    return %c0_i32, %c0_i32_0 : i32, i32
  }
  func.func @transform_6(%arg0: i32, %arg1: i32) -> (i32, i32) {
    %0 = arith.muli %arg1, %arg0 : i32
    %c0_i32 = arith.constant 0 : i32
    %c0_i32_0 = arith.constant 0 : i32
    return %0, %c0_i32 : i32, i32
  }
}

</mosaic_0001>

<bundles_post_ra>
// kernel: tpu_custom_call.1
= control target key start
LH: loop header
LB: loop body
LE: loop exit
PB: predicated region body
PF: predicated region fallthrough
CT: control target
= control target key end

     0   :  { %s1524_s0 = inlined_call_operand.hbm [shape: f32[48,128], index: 0, kind: input, shape index: {}]   ;;  %s1525_s1 = inlined_call_operand.hbm [shape: f32[128,128], index: 1, kind: input, shape index: {}]   ;;  %s1526_s2 = inlined_call_operand.vmem [shape: f32[1,128], index: 2, kind: input, shape index: {}]   ;;  %s1527_s3 = inlined_call_operand.vmem [shape: f32[1,128], index: 3, kind: input, shape index: {}]   ;;  %s1528_s4 = inlined_call_operand.hbm [shape: f32[128,128], index: 4, kind: input, shape index: {}]   ;;  %s1529_s5 = inlined_call_operand.vmem [shape: f32[1,128], index: 5, kind: input, shape index: {}]   ;;  %s1530_s6 = inlined_call_operand.hbm [shape: f32[48,128], index: 6, kind: output, shape index: {}]  }
   0x1   :  { %1542 = sst [smem:[#allocation22_spill]] %s1525_s1 }
   0x2   :  { %1543 = sst [smem:[#allocation23_spill]] %s1526_s2 }
   0x3   :  { %1544 = sst [smem:[#allocation24_spill]] %s1527_s3 }
   0x4   :  { %1545 = sst [smem:[#allocation25_spill]] %s1528_s4 }
   0x5   :  { %1546 = sst [smem:[#allocation26_spill]] %s1529_s5 }
   0x6   :  { %1547 = sst [smem:[#allocation27_spill]] %s1530_s6 }
   0x7   :  { %11 = vsyncpa [#allocation6], 0 }
   0x8   :  { %13 = vsyncpa [#allocation6 + $0x1], 0 }
   0x9   :  { %14 = vsyncpa [#allocation9], 0 }
   0xa   :  { %15 = vsyncpa [#allocation7], 0 }
   0xb   :  { %17 = vsyncpa [#allocation7 + $0x1], 0  ;;  %s1236_s21 = smov 0   ;;  %s1238_s22 = smov 0  }
   0xc   :  { %s1240_s23 = smov 0   ;;  %s1242_s24 = smov 0  }
   0xd   :  { %s1244_s25 = smov 0   ;;  %s1246_s26 = smov 0  }
   0xe   :  { %s1248_s27 = smov 0   ;;  %s1250_s28 = smov 0  }
   0xf   :  { %s1252_s29 = smov 0   ;;  %s1254_s30 = smov 0  }
  0x10   :  { %s1256_s7 = smov 0  }
  0x11 LB: > { %1548 = sst [smem:[#allocation15_spill]] %s1150_s21  ;;  %s723_s8 = sadd.s32 4294967295, %s1190_s7   ;;  %s1190_s7 = sphi %s1256_s7, %s23_s7   ;;  %s1186_s30 = sphi %s1254_s30, %s1596_s30   ;;  %s1182_s29 = sphi %s1252_s29, %s1595_s29   ;;  %s1178_s28 = sphi %s1250_s28, %s1588_s28   ;;  %s1174_s27 = sphi %s1248_s27, %s1587_s27   ;;  %s1170_s26 = sphi %s1246_s26, %s1594_s26   ;;  %s1166_s25 = sphi %s1244_s25, %s1593_s25   ;;  %s1162_s24 = sphi %s1242_s24, %s1592_s24   ;;  %s1158_s23 = sphi %s1240_s23, %s1591_s23   ;;  %s1154_s22 = sphi %s1238_s22, %s1590_s22   ;;  %s1150_s21 = sphi %s1236_s21, %s1589_s21  }
  0x12   : > { %1549 = sst [smem:[#allocation16_spill]] %s1174_s27  ;;  %s724_s9 = sadd.s32 4294967294, %s1190_s7  }
  0x13   : > { %1550 = sst [smem:[#allocation17_spill]] %s1178_s28  ;;  %p59_p0 = scmp.ne.s32.totalorder %s1166_s25, %s1162_s24 }
  0x14   : > { %1551 = sst [smem:[#allocation18_spill]] %s1182_s29  ;;  %p1292_p1 = scmp.eq.s32.totalorder %s723_s8, 0 }
  0x15   : > { %1552 = sst [smem:[#allocation19_spill]] %s1186_s30  ;;  %p189_p2 = scmp.ne.s32.totalorder %s1158_s23, %s1154_s22 }
  0x16   : > { %p1301_p3 = por %p1292_p1, %p59_p0  ;;  %p190_p4 = scmp.eq.s32.totalorder %s723_s8, 5 }
  0x17   : > { %p195_p5 = scmp.ne.s32.totalorder %s1154_s22, %s1150_s21  ;;  %p196_p6 = scmp.eq.s32.totalorder %s724_s9, 5 }
  0x18   : > { %p1307_p7 = por %p190_p4, %p189_p2  ;;  %p725_p8 = scmp.ge.s32.totalorder %s1190_s7, 1 }
  0x19   : > { %p1312_p9 = por %p196_p6, %p195_p5  ;;  %p203_p10 = scmp.lt.s32.totalorder %s1190_s7, 7 }
  0x1a   : > { %s1555_s13 = scalar_select %p1307_p7, 1, 0 }
  0x1b   : > { %s1557_s14 = scalar_select %p1312_p9, 1, 0 }
  0x1c   : > { %1556 = sst [smem:[#allocation20_spill]] %s1555_s13  ;;  %p1317_p11 = pnand %p725_p8, %p203_p10 }
  0x1d   : > { %1558 = sst [smem:[#allocation21_spill]] %s1557_s14  ;;  %s1192_s16 = smov [#allocation8]  }
  0x1e   : > { %s215_s17 = sshll.u32 %s1192_s16, 4  ;;  %p868_p12 = pneg %p1317_p11  ;;  %s216_s17 = int_to_ptr.vmem [resolvable:$true] %s215_s17 }
  0x1f   : > { %s1193_s19 = smov [#allocation10]   ;;  %s997_s24 = scalar_lea.vmem %s216_s17, 2048 }
  0x20   : > { %p1325_p13 = pnand %p868_p12, %p1292_p1  ;;  %s234_s20 = sshll.u32 %s1193_s19, 4  ;;  %s235_s20 = int_to_ptr.vmem [resolvable:$true] %s234_s20 }
  0x21   : > { %p998_p2 = scmp.ne.s32.totalorder %s216_s17, %s997_s24  ;;  %p1005_p6 = scmp.lt.s32.totalorder %s216_s17, %s216_s17 }
  0x22   : > { %p988_p0 = pneg %p1325_p13  ;;  %p1006_p8 = scmp.lt.s32.totalorder %s997_s24, %s997_s24 }
  0x24   : > { %p1000_p4 = pnand %p998_p2, %p988_p0  ;;  %p1007_p10 = por %p1006_p8, %p1005_p6 }
  0x26   : > { %p1001_p5 = pneg %p1000_p4 }
  0x28   : > { %p1008_p12 = pnand %p1007_p10, %p1001_p5 }
  0x2a   : > { %1011 = shalt.err (!%p1008_p12)
}
  0x2b   : > { %s1532_s8 = smov 128   ;;  %s1533_s9 = smov 8  }
  0x2c   : > { %s1561_s1 = sld [smem:[#allocation22_spill]]  ;;  %s1023_s11 = scalar_lea.vmem %s235_s20, 2048 }
  0x2d   : > { %p1024_p2 = scmp.ne.s32.totalorder %s235_s20, %s1023_s11  ;;  %p1031_p5 = scmp.lt.s32.totalorder %s235_s20, %s235_s20 }
  0x2e   : > { %p1032_p8 = scmp.lt.s32.totalorder %s1023_s11, %s1023_s11 }
  0x2f   : > { %p1026_p4 = pnand %p1024_p2, %p988_p0 }
  0x30   : > { %p1033_p10 = por %p1032_p8, %p1031_p5 }
  0x31   : > { %p1027_p6 = pneg %p1026_p4 }
  0x32   : > { %871 = dma.hbm_to_vmem [thread:$0]  (!%p1325_p13), %s1561_s1, 2048, %s216_s17, [#allocation9], %s1532_s8, %s1532_s8, %s1533_s9  }
  0x33   : > { %p1034_p12 = pnand %p1033_p10, %p1027_p6 }
  0x35   : > { %1037 = shalt.err (!%p1034_p12)
}
  0x36   : > { %s1562_s4 = sld [smem:[#allocation25_spill]]  ;;  %s32_s11 = sadd.s32 1, %s1182_s29 }
  0x37   : > { %s35_s17 = sadd.s32 1, %s1186_s30  ;;  %p33_p0 = scmp.ge.s32.totalorder %s32_s11, 3 }
  0x38   : > { %s39_s18 = ssub.s32 1, %s1186_s30  ;;  %s46_s14 = sadd.s32 1, %s1170_s26 }
  0x39   : > { %s40_s16 = smul.u32 %s1182_s29, %s39_s18  ;;  %s1598_s11 = smov (%p33_p0, %s32_s11), 0 }
  0x3a   : > { %s1600_s17 = smov (!%p33_p0, %s35_s17), %s1186_s30  ;;  %p53_p2 = scmp.ne.s32.totalorder %s1170_s26, %s1166_s25 }
  0x3b   : > { %p54_p4 = scmp.eq.s32.totalorder %s1190_s7, 0  ;;  %p37_p6 = scmp.ge.s32.totalorder %s1600_s17, 2 }
  0x3c   : > { %874 = dma.hbm_to_vmem [thread:$0]  (!%p1325_p13), %s1562_s4, 2048, %s235_s20, [#allocation9], %s1532_s8, %s1532_s8, %s1533_s9  }
  0x3d   : > { %s174_s19 = smul.u32 %s1182_s29, %s1186_s30  ;;  %p1366_p13 = por %p54_p4, %p53_p2 }
  0x3e   : > { %p885_p5 = scmp.lt.s32.totalorder %s1190_s7, 6  ;;  %s1602_s17 = smov (%p37_p6, %s1600_s17), 0 }
  0x3f   : > { %s251_s24 = sand.u32 1, %s1170_s26   ;;  %s748_s18 = sshll.u32 %s40_s16, 8 }
  0x40   : > { %s41_s8 = ssub.s32 1, %s1602_s17  ;;  %s175_s9 = smul.u32 %s1602_s17, %s1598_s11 }
  0x41   : > { %s42_s1 = smul.u32 %s41_s8, %s1598_s11  ;;  %s729_s21 = sshll.u32 %s251_s24, 4 }
  0x42   : > { %s176_s4 = ssub.s32 %s174_s19, %s175_s9  ;;  %s1564_s30 = sadd.s32 1, %s1158_s23 }
  0x43   : > { %s43_s6 = ssub.s32 %s40_s16, %s42_s1  ;;  %p177_p8 = scmp.eq.s32.totalorder %s176_s4, 0 }
  0x44   : > { %p44_p10 = scmp.eq.s32.totalorder %s43_s6, 0  ;;  %s263_s2 = scalar_lea.hbm %s1524_s0, %s748_s18 }
  0x45   : > { %s1381_s29 = scalar_select %p177_p8, %s1158_s23, %s1564_s30  }
  0x46   : > { %s1384_s13 = scalar_select %p44_p10, %s1170_s26, %s46_s14  }
  0x47   : > { %s255_s28 = scalar_lea.vmem [#allocation5], %s729_s21  ;;  %p1393_p12 = pnand %p885_p5, %p1366_p13 }
  0x48   : > { %s264_s27 = sshll.u32 %s255_s28, 4  ;;  %s252_s1 = scalar_lea.sflag [#allocation6], %s251_s24  ;;  %s265_s27 = int_to_ptr.vmem [resolvable:$true] %s264_s27 }
  0x49   : > { %p1040_p0 = pneg %p1393_p12  ;;  %s1051_s4 = scalar_lea.vmem %s265_s27, 256 }
  0x4a   : > { %p1052_p2 = scmp.ne.s32.totalorder %s265_s27, %s1051_s4  ;;  %s1196_s6 = smov [#allocation5]  }
  0x4b   : > { %s1056_s3 = sshll.u32 %s1196_s6, 4  ;;  %s1057_s3 = int_to_ptr.vmem [resolvable:$false] %s1056_s3 }
  0x4c   : > { %p1054_p4 = pnand %p1052_p2, %p1040_p0  ;;  %s1058_s5 = scalar_lea.vmem %s1057_s3, 512 }
  0x4d   : > { %p1059_p8 = scmp.lt.s32.totalorder %s265_s27, %s1057_s3  ;;  %p1060_p10 = scmp.lt.s32.totalorder %s1058_s5, %s1051_s4 }
  0x4e   : > { %p1055_p6 = pneg %p1054_p4 }
  0x4f   : > { %p1061_p9 = por %p1060_p10, %p1059_p8 }
  0x51   : > { %p1062_p7 = pnand %p1061_p9, %p1055_p6 }
  0x53   : > { %1065 = shalt.err (!%p1062_p7)
}
  0x54   : > { %s1566_s21 = smov 8   ;;  %s1567_s28 = smov 128  }
  0x55   : > { %878 = dma.hbm_to_vmem [thread:$0]  (!%p1393_p12), %s263_s2, 256, %s265_s27, %s252_s1, %s1567_s28, %s1567_s28, %s1566_s21  }
  0x56   : > { %276 = sbr.rel (%p1317_p11) target bundleno = 692 (0x2b4), region = 44  ;;  %s278_s30 = sand.u32 (!%p1317_p11), 1, %s1166_s25  }
  0x57   : > { %s1407_s9 = sshll.u32 (!%p1317_p11), %s278_s30, 4  ;;  %s279_s16 = scalar_lea.sflag (!%p1317_p11), [#allocation6], %s278_s30 }
  0x58   : > { %s282_s14 = scalar_lea.vmem (!%p1317_p11), [#allocation5], %s1407_s9 }
  0x5b   : > { %1137 = dma.done.wait (%p1301_p3), %s279_s16, 256  }
  0x5c   : > { %1139 = vsyncadd (%p1301_p3), %s279_s16, 4294967040 }
  0x5d   : > { %1141 = dma.done.wait (%p1292_p1), [#allocation9], 4096  }
  0x5e   : > { %1143 = vsyncadd (%p1292_p1), [#allocation9], 4294963200  ;;  %s1568_s2 = sld [smem:[#allocation16_spill]]  ;;  %s316_s15 = sand.u32 1, %s1154_s22  }
  0x5f   : > { %s1569_s27 = sld [smem:[#allocation17_spill]]  ;;  %s736_s20 = sshll.u32 %s316_s15, 4 }
  0x60   : > { %s1426_s12 = scalar_lea.vmem [#allocation11], %s736_s20 }
  0x64   : > { %s737_s19 = sshll.u32 %s1568_s2, 4  ;;  %p326_p9 = scmp.eq.s32.totalorder %s1568_s2, 0 }
  0x65   : > { %p325_p7 = scmp.eq.s32.totalorder %s1569_s27, 0 }
  0x67   : > { %p327_p3 = pnand %p326_p9, %p325_p7 }
  0x69   : > { %330 = sbr.rel (%p327_p3) target bundleno = 112 (0x70), region = 60 }
  0x6e   : > { %v1197_v0 = vmov 0.0  }
  0x6f   : > { %331 = vst [vmem:[#allocation3] sm:$0x1] %v1197_v0  ;;  %332 = vst [vmem:[#allocation4] sm:$0x1] %v1197_v0 }
  0x70 PF: > { %s1570_s10 = sld [smem:[#allocation17_spill]] }
  0x76   : > { %p738_p1 = scmp.ne.s32.totalorder %s1570_s10, 0 }
  0x77   : > { %s429_s18 = scalar_lea.vmem (!%p738_p1), [#allocation2], %s737_s19 }
  0x78   : > { %335 = sbr.rel (%p738_p1) target bundleno = 372 (0x174), region = 64 }
  0x7d   : > { %v353_v1 = vld [vmem:[#allocation8 + $0x78] sm:$0xff]  ;;  %v352_v2 = vld [vmem:[#allocation8 + $0x70] sm:$0xff]  ;;  %v351_v3 = vld [vmem:[#allocation8 + $0x68] sm:$0xff] }
  0x7e   : > { %786 = vmatprep.subr.mxu0 %v353_v1  ;;  %v350_v4 = vld [vmem:[#allocation8 + $0x60] sm:$0xff]  ;;  %v349_v6 = vld [vmem:[#allocation8 + $0x58] sm:$0xff]  ;;  %v348_v7 = vld [vmem:[#allocation8 + $0x50] sm:$0xff] }
  0x7f   : > { %787 = vmatpush3.msra.mxu0 %v353_v1  ;;  %v336_v5 = vld [vmem:[%s282_s14] sm:$0xff]  ;;  %v347_v8 = vld [vmem:[#allocation8 + $0x48] sm:$0xff]  ;;  %v345_v10 = vld [vmem:[#allocation8 + $0x38] sm:$0xff] }
  0x80   : > { %788 = vmatprep.subr.mxu0 %v352_v2  ;;  %818 = vmatprep.mubr.f32.mxu0 %v336_v5  ;;  %v346_v9 = vld [vmem:[#allocation8 + $0x40] sm:$0xff]  ;;  %v344_v11 = vld [vmem:[#allocation8 + $0x30] sm:$0xff]  ;;  %v343_v12 = vld [vmem:[#allocation8 + $0x28] sm:$0xff] }
  0x81   : > { %789 = vmatpush3.msra.mxu0 %v352_v2  ;;  %v342_v13 = vld [vmem:[#allocation8 + $0x20] sm:$0xff]  ;;  %v341_v14 = vld [vmem:[#allocation8 + $0x18] sm:$0xff]  ;;  %v340_v15 = vld [vmem:[#allocation8 + $0x10] sm:$0xff] }
  0x82   : > { %790 = vmatprep.subr.mxu0 %v351_v3  ;;  %v339_v16 = vld [vmem:[#allocation8 + $0x8] sm:$0xff]  ;;  %v338_v17 = vld [vmem:[#allocation8] sm:$0xff]  ;;  %v432_v34 = vld [vmem:[#allocation3] sm:$0x1] }
  0x83   : > { %791 = vmatpush3.msra.mxu0 %v351_v3  ;;  %v337_v18 = vld [vmem:[%s282_s14 + $0x8] sm:$0xff] }
  0x84   : > { %792 = vmatprep.subr.mxu0 %v350_v4  ;;  %v442_v37 = vld [vmem:[#allocation4] sm:$0x1] }
  0x85   : > { %793 = vmatpush3.msra.mxu0 %v350_v4 }
  0x86   : > { %794 = vmatprep.subr.mxu0 %v349_v6 }
  0x87   : > { %795 = vmatpush3.msra.mxu0 %v349_v6 }
  0x88   : > { %796 = vmatprep.subr.mxu0 %v348_v7 }
  0x89   : > { %797 = vmatpush3.msra.mxu0 %v348_v7 }
  0x8a   : > { %798 = vmatprep.subr.mxu0 %v347_v8 }
  0x8b   : > { %799 = vmatpush3.msra.mxu0 %v347_v8 }
  0x8c   : > { %800 = vmatprep.subr.mxu0 %v346_v9 }
  0x8d   : > { %801 = vmatpush3.msra.mxu0 %v346_v9 }
  0x8e   : > { %802 = vmatprep.subr.mxu0 %v345_v10 }
  0x8f   : > { %803 = vmatpush3.msra.mxu0 %v345_v10 }
  0x90   : > { %804 = vmatprep.subr.mxu0 %v344_v11 }
  0x91   : > { %805 = vmatpush3.msra.mxu0 %v344_v11 }
  0x92   : > { %806 = vmatprep.subr.mxu0 %v343_v12 }
  0x93   : > { %807 = vmatpush3.msra.mxu0 %v343_v12 }
  0x94   : > { %808 = vmatprep.subr.mxu0 %v342_v13 }
  0x95   : > { %809 = vmatpush3.msra.mxu0 %v342_v13 }
  0x96   : > { %810 = vmatprep.subr.mxu0 %v341_v14 }
  0x97   : > { %811 = vmatpush3.msra.mxu0 %v341_v14 }
  0x98   : > { %812 = vmatprep.subr.mxu0 %v340_v15 }
  0x99   : > { %813 = vmatpush3.msra.mxu0 %v340_v15 }
  0x9a   : > { %814 = vmatprep.subr.mxu0 %v339_v16 }
  0x9b   : > { %815 = vmatpush3.msra.mxu0 %v339_v16 }
  0x9c   : > { %816 = vmatprep.subr.mxu0 %v338_v17 }
  0x9d   : > { %817 = vmatpush3.msra.mxu0 %v338_v17 }
  0x9e   : > { %819 = vmatmul.mubr.f32.vlgmr.msra.gmra.mxu0 %v337_v18 }
 0x15e   : > { %v820_v19 = vpop.f32.mrf.mxu0 }
 0x15f   : > { %431 = vst [vmem:[%s429_s18 + $0x8] sm:$0xff] %v820_v19  ;;  %v444_v21 = vmul.f32 %v820_v19, %v820_v19 }
 0x160   : > { %v420_v20 = vpop.f32.mrf.mxu0 }
 0x161   : > { %430 = vst [vmem:[%s429_s18] sm:$0xff] %v420_v20  ;;  %v433_v22 = vadd.f32 %v820_v19, %v420_v20  ;;  %v443_v23 = vmul.f32 %v420_v20, %v420_v20 }
 0x163   : > { %v434_v24 = vrot.slane %v433_v22, 4  ;;  %v445_v25 = vadd.f32 %v444_v21, %v443_v23 }
 0x165   : > { %v435_v26 = vadd.f32 %v434_v24, %v433_v22  ;;  %v446_v27 = vrot.slane %v445_v25, 4 }
 0x167   : > { %v436_v28 = vrot.slane %v435_v26, 2  ;;  %v447_v29 = vadd.f32 %v446_v27, %v445_v25 }
 0x169   : > { %v437_v30 = vadd.f32 %v436_v28, %v435_v26  ;;  %v448_v31 = vrot.slane %v447_v29, 2 }
 0x16b   : > { %v438_v32 = vrot.slane %v437_v30, 1  ;;  %v449_v33 = vadd.f32 %v448_v31, %v447_v29 }
 0x16d   : > { %v439_v35 = vadd.f32 %v438_v32, %v437_v30  ;;  %v450_v36 = vrot.slane %v449_v33, 1 }
 0x16f   : > { %v440_v38 = vadd.f32 %v439_v35, %v432_v34  ;;  %v451_v39 = vadd.f32 %v450_v36, %v449_v33 }
 0x171   : > { %441 = vst [vmem:[#allocation3] sm:$0x1] %v440_v38  ;;  %v452_v40 = vadd.f32 %v451_v39, %v442_v37 }
 0x173   : > { %453 = vst [vmem:[#allocation4] sm:$0x1] %v452_v40 }
 0x174 PF: > { %s1572_s8 = sld [smem:[#allocation17_spill]] }
 0x17a   : > { %p454_p11 = scmp.eq.s32.totalorder %s1572_s8, 1 }
 0x17c   : > { %p455_p13 = pnand %p454_p11, %p326_p9 }
 0x17d   : > { %s1574_s3 = sld [smem:[#allocation23_spill]] (!%p455_p13) }
 0x17e   : > { %458 = sbr.rel (%p455_p13) target bundleno = 419 (0x1a3), region = 68  ;;  %s1575_s28 = sld [smem:[#allocation24_spill]] (!%p455_p13) }
 0x183   : > { %v459_v41 = vld [vmem:[#allocation3] sm:$0x1]  ;;  %v461_v42 = vld [vmem:[#allocation4] sm:$0x1]  ;;  %v468_v49 = vld [vmem:[%s1574_s3] sm:$0x1] }
 0x184   : > { %v460_v43 = vmul.f32 0.025, %v459_v41  ;;  %v462_v44 = vmul.f32 0.025, %v461_v42  ;;  %v471_v52 = vld [vmem:[%s1575_s28] sm:$0x1] }
 0x186   : > { %v463_v45 = vmul.f32 %v460_v43, %v460_v43 }
 0x188   : > { %v464_v46 = vsub.f32 %v462_v44, %v463_v45 }
 0x18a   : > { %v465_v47 = vmax.f32 %v464_v46, 0.0 }
 0x18c   : > { %v466_v48 = vadd.f32 1e-05, %v465_v47 }
 0x18e   : > { %984 = vrsqrt.f32 %v466_v48 }
 0x19b   : > { %v985_v50 = vpop.eup %984 }
 0x19c   : > { %v469_v51 = vmul.f32 %v985_v50, %v468_v49 }
 0x19e   : > { %470 = vst [vmem:[#allocation3] sm:$0x1] %v469_v51  ;;  %v472_v53 = vmul.f32 %v469_v51, %v460_v43 }
 0x1a0   : > { %v473_v54 = vsub.f32 %v471_v52, %v472_v53 }
 0x1a2   : > { %474 = vst [vmem:[#allocation4] sm:$0x1] %v473_v54 }
 0x1a3 PF: > { %s1576_s30 = sld [smem:[#allocation17_spill]] }
 0x1a9   : > { %p739_p5 = scmp.ne.s32.totalorder %s1576_s30, 1 }
 0x1aa   : > { %s478_s16 = scalar_lea.vmem (!%p739_p5), [#allocation2], %s737_s19  ;;  %s1578_s27 = sld [smem:[#allocation26_spill]] (!%p739_p5) }
 0x1ab   : > { %477 = sbr.rel (%p739_p5) target bundleno = 663 (0x297), region = 72 }
 0x1b0   : > { %v516_v55 = vld [vmem:[#allocation10 + $0x78] sm:$0xff]  ;;  %v515_v56 = vld [vmem:[#allocation10 + $0x70] sm:$0xff]  ;;  %v514_v57 = vld [vmem:[#allocation10 + $0x68] sm:$0xff] }
 0x1b1   : > { %821 = vmatprep.subr.mxu0 %v516_v55  ;;  %v513_v58 = vld [vmem:[#allocation10 + $0x60] sm:$0xff]  ;;  %v479_v59 = vld [vmem:[%s478_s16] sm:$0xff]  ;;  %v512_v60 = vld [vmem:[#allocation10 + $0x58] sm:$0xff] }
 0x1b2   : > { %822 = vmatpush3.msra.mxu0 %v516_v55  ;;  %v740_v61 = vld [vmem:[#allocation3] ss:$0 sm:$0xff]  ;;  %v741_v62 = vld [vmem:[#allocation4] ss:$0 sm:$0xff]  ;;  %v511_v0 = vld [vmem:[#allocation10 + $0x50] sm:$0xff] }
 0x1b3   : > { %823 = vmatprep.subr.mxu0 %v515_v56  ;;  %v489_v63 = vmul.f32 %v740_v61, %v479_v59  ;;  %v510_v2 = vld [vmem:[#allocation10 + $0x48] sm:$0xff]  ;;  %v509_v4 = vld [vmem:[#allocation10 + $0x40] sm:$0xff]  ;;  %v508_v5 = vld [vmem:[#allocation10 + $0x38] sm:$0xff] }
 0x1b4   : > { %824 = vmatpush3.msra.mxu0 %v515_v56  ;;  %v507_v6 = vld [vmem:[#allocation10 + $0x30] sm:$0xff]  ;;  %v506_v7 = vld [vmem:[#allocation10 + $0x28] sm:$0xff]  ;;  %v505_v9 = vld [vmem:[#allocation10 + $0x20] sm:$0xff] }
 0x1b5   : > { %825 = vmatprep.subr.mxu0 %v514_v57  ;;  %v497_v1 = vadd.f32 %v741_v62, %v489_v63  ;;  %v480_v8 = vld [vmem:[%s478_s16 + $0x8] sm:$0xff]  ;;  %v502_v14 = vld [vmem:[#allocation10 + $0x8] sm:$0xff]  ;;  %v501_v15 = vld [vmem:[#allocation10] sm:$0xff] }
 0x1b6   : > { %826 = vmatpush3.msra.mxu0 %v514_v57  ;;  %v490_v10 = vmul.f32 %v740_v61, %v480_v8  ;;  %v504_v11 = vld [vmem:[#allocation10 + $0x18] sm:$0xff]  ;;  %v503_v12 = vld [vmem:[#allocation10 + $0x10] sm:$0xff]  ;;  %v742_v17 = vld [vmem:[%s1578_s27] ss:$0 sm:$0xff] }
 0x1b7   : > { %827 = vmatprep.subr.mxu0 %v513_v58  ;;  %v499_v3 = vmax.f32 %v497_v1, 0.0 }
 0x1b8   : > { %828 = vmatpush3.msra.mxu0 %v513_v58  ;;  %v498_v13 = vadd.f32 %v741_v62, %v490_v10 }
 0x1b9   : > { %829 = vmatprep.subr.mxu0 %v512_v60  ;;  %853 = vmatprep.mubr.f32.mxu0 %v499_v3 }
 0x1ba   : > { %830 = vmatpush3.msra.mxu0 %v512_v60  ;;  %v500_v16 = vmax.f32 %v498_v13, 0.0 }
 0x1bb   : > { %831 = vmatprep.subr.mxu0 %v511_v0 }
 0x1bc   : > { %832 = vmatpush3.msra.mxu0 %v511_v0 }
 0x1bd   : > { %833 = vmatprep.subr.mxu0 %v510_v2 }
 0x1be   : > { %834 = vmatpush3.msra.mxu0 %v510_v2 }
 0x1bf   : > { %835 = vmatprep.subr.mxu0 %v509_v4 }
 0x1c0   : > { %836 = vmatpush3.msra.mxu0 %v509_v4 }
 0x1c1   : > { %837 = vmatprep.subr.mxu0 %v508_v5 }
 0x1c2   : > { %838 = vmatpush3.msra.mxu0 %v508_v5 }
 0x1c3   : > { %839 = vmatprep.subr.mxu0 %v507_v6 }
 0x1c4   : > { %840 = vmatpush3.msra.mxu0 %v507_v6 }
 0x1c5   : > { %841 = vmatprep.subr.mxu0 %v506_v7 }
 0x1c6   : > { %842 = vmatpush3.msra.mxu0 %v506_v7 }
 0x1c7   : > { %843 = vmatprep.subr.mxu0 %v505_v9 }
 0x1c8   : > { %844 = vmatpush3.msra.mxu0 %v505_v9 }
 0x1c9   : > { %845 = vmatprep.subr.mxu0 %v504_v11 }
 0x1ca   : > { %846 = vmatpush3.msra.mxu0 %v504_v11 }
 0x1cb   : > { %847 = vmatprep.subr.mxu0 %v503_v12 }
 0x1cc   : > { %848 = vmatpush3.msra.mxu0 %v503_v12 }
 0x1cd   : > { %849 = vmatprep.subr.mxu0 %v502_v14 }
 0x1ce   : > { %850 = vmatpush3.msra.mxu0 %v502_v14 }
 0x1cf   : > { %851 = vmatprep.subr.mxu0 %v501_v15 }
 0x1d0   : > { %852 = vmatpush3.msra.mxu0 %v501_v15 }
 0x1d1   : > { %854 = vmatmul.mubr.f32.vlgmr.msra.gmra.mxu0 %v500_v16 }
 0x291   : > { %v855_v18 = vpop.f32.mrf.mxu0 }
 0x292   : > { %v596_v19 = vadd.f32 %v855_v18, %v742_v17 }
 0x293   : > { %v590_v20 = vpop.f32.mrf.mxu0 }
 0x294   : > { %600 = vst [vmem:[%s1426_s12 + $0x8] sm:$0xff] %v596_v19  ;;  %v591_v21 = vadd.f32 %v742_v17, %v590_v20 }
 0x296   : > { %599 = vst [vmem:[%s1426_s12] sm:$0xff] %v591_v21 }
 0x297 PF: > { %s1579_s19 = sld [smem:[#allocation17_spill]]  ;;  %s616_s18 = sshll.u32 %s1426_s12, 4  ;;  %s1455_s18 = int_to_ptr.vmem [resolvable:$true] %s616_s18 }
 0x298   : > { %s1580_s20 = sld [smem:[#allocation16_spill]]  ;;  %s1464_s5 = scalar_lea.sflag [#allocation7], %s316_s15 }
 0x299   : > { %s1581_s10 = sld [smem:[#allocation20_spill]]  ;;  %s1066_s21 = scalar_lea.vmem %s1455_s18, 256 }
 0x29a   : > { %s1582_s6 = sld [smem:[#allocation27_spill]]  ;;  %p1067_p12 = scmp.ne.s32.totalorder %s1455_s18, %s1066_s21 }
 0x29b   : > { %s1198_s12 = smov [#allocation11]  }
 0x29c   : > { %s1070_s28 = sshll.u32 %s1198_s12, 4  ;;  %s1071_s28 = int_to_ptr.vmem [resolvable:$false] %s1070_s28 }
 0x29d   : > { %s1072_s30 = scalar_lea.vmem %s1071_s28, 512  ;;  %p1073_p6 = scmp.lt.s32.totalorder %s1455_s18, %s1071_s28 }
 0x29e   : > { %s609_s24 = smul.u32 %s1580_s20, %s1579_s19  ;;  %p1074_p8 = scmp.lt.s32.totalorder %s1072_s30, %s1066_s21 }
 0x29f   : > { %p1583_p0 = scmp.ne.s32.totalorder %s1581_s10, 0 }
 0x2a0   : > { %s749_s8 = sshll.u32 %s609_s24, 8  ;;  %p1075_p10 = por %p1074_p8, %p1073_p6 }
 0x2a1   : > { %s1460_s3 = scalar_lea.hbm %s1582_s6, %s749_s8  ;;  %p1068_p2 = pnand %p1067_p12, %p1583_p0 }
 0x2a3   : > { %p1069_p4 = pneg %p1068_p2 }
 0x2a5   : > { %p1076_p7 = pnand %p1075_p10, %p1069_p4 }
 0x2a7   : > { %1079 = shalt.err (!%p1076_p7)
}
 0x2a8   : > { %s1080_s15 = scalar_lea.hbm %s1460_s3, 256  ;;  %s1084_s14 = scalar_lea.hbm %s1582_s6, 768 }
 0x2a9   : > { %p1081_p9 = scmp.ne.s32.totalorder %s1460_s3, %s1080_s15  ;;  %p1085_p11 = scmp.lt.s32.totalorder %s1460_s3, %s1582_s6 }
 0x2aa   : > { %p1086_p13 = scmp.lt.s32.totalorder %s1084_s14, %s1080_s15 }
 0x2ab   : > { %p1082_p3 = pnand %p1081_p9, %p1583_p0 }
 0x2ac   : > { %p1087_p5 = por %p1086_p13, %p1085_p11 }
 0x2ad   : > { %p1083_p1 = pneg %p1082_p3 }
 0x2af   : > { %p1088_p12 = pnand %p1087_p5, %p1083_p1 }
 0x2b1   : > { %1091 = shalt.err (!%p1088_p12)
}
 0x2b2   : > { %s1199_s19 = smov 128   ;;  %s1200_s20 = smov 8  }
 0x2b3   : > { %866 = dma.vmem_to_hbm [thread:$0]  (%p1583_p0), %s1455_s18, 256, %s1460_s3, %s1464_s5, %s1199_s19, %s1199_s19, %s1200_s20  }
 0x2b4 PF: > { %s1584_s24 = sld [smem:[#allocation15_spill]]  ;;  %p888_p2 = scmp.ge.s32.totalorder %s1190_s7, 2 }
 0x2b5   : > { %s1585_s8 = sld [smem:[#allocation21_spill]] }
 0x2ba   : > { %s631_s1 = sand.u32 1, %s1584_s24  }
 0x2bb   : > { %p1586_p4 = scmp.ne.s32.totalorder %s1585_s8, 0  ;;  %s632_s4 = scalar_lea.sflag [#allocation7], %s631_s1 }
 0x2bd   : > { %p880_p6 = pnand %p888_p2, %p1586_p4 }
 0x2bf   : > { %p881_p8 = pneg %p880_p6 }
 0x2c1   : > { %1145 = dma.done.wait (%p881_p8), %s632_s4, 256  }
 0x2c2   : > { %1147 = vsyncadd (%p881_p8), %s632_s4, 4294967040  ;;  %s23_s7 = sadd.s32 1, %s1190_s7   ;;  %s1587_s27 = sld [smem:[#allocation18_spill]] }
 0x2c3   : > { %p20_p10 = scmp.ge.s32.totalorder %s23_s7, 8   ;;  %s1588_s28 = sld [smem:[#allocation19_spill]] }
 0x2c4   : > { %s1589_s21 = smov %s1154_s22  ;;  %s1590_s22 = smov %s1158_s23 }
 0x2c5   : > { %s1591_s23 = smov %s1381_s29  ;;  %s1592_s24 = smov %s1166_s25 }
 0x2c6   : > { %s1593_s25 = smov %s1170_s26  ;;  %s1594_s26 = smov %s1384_s13 }
 0x2c7   : > { %s1595_s29 = smov %s1598_s11  ;;  %s1596_s30 = smov %s1602_s17 }
 0x2c8   :  { %22 = sbr.rel (!%p20_p10) target bundleno = 17 (0x11), region = 115 }
 0x2cd   :  { %637 = vsyncpa [#allocation6], 1 }
 0x2ce   :  { %639 = vsyncpa [#allocation6 + $0x1], 1 }
 0x2cf   :  { %640 = vsyncpa [#allocation9], 1 }
 0x2d0   :  { %641 = vsyncpa [#allocation7], 1 }
 0x2d1   :  { %643 = vsyncpa [#allocation7 + $0x1], 1 }

</bundles_post_ra>
